<compile_context>
chip_gen: v7x
topology: tpu7x:2x2x1
jax: 0.10.0
libtpu: 0.0.40
codegen_flags: <defaults>
</compile_context>

<pallas_src>
import functools
import math

import jax
import jax.numpy as jnp
from jax import lax
from jax.experimental import pallas as pl
from jax.experimental.pallas import tpu as pltpu


# ----------------------------------------------------------------------------
# Kernel: one (batch, H-tile) grid step.
# ----------------------------------------------------------------------------
def _upconv_kernel(awt_ref, srow_ref, xh_ref, o_ref, acc_ref, *,
                   tH, W, K, KH, neg_slope):
    # awt_ref : VMEM (KH, C*w, K*W)     grid-invariant (col-selector x weights)
    # srow_ref: VMEM (H + KH - 1, h)    grid-invariant zero-padded row selector
    # xh_ref  : VMEM (1, h, C*w)        pre-upsample image (r, c, s), per batch
    # o_ref   : VMEM (1, K, tH, W)      NCHW output tile
    # acc_ref : VMEM (tH, K*W) f32      accumulator scratch (no vreg spills)
    t = pl.program_id(1)
    y0 = t * tH
    xh = xh_ref[0]                                              # (h, C*w)

    for kh in range(KH):
        # Row-upsample selector rows for this tile and tap (dynamic slice of
        # the hoisted table; halo rows outside [0, H) are all-zero -> zero pad).
        srow = srow_ref[pl.ds(y0 + kh, tH), :]                  # (tH, h)
        r = jnp.dot(srow, xh, preferred_element_type=jnp.float32)       # (tH, C*w)
        contrib = jnp.dot(r, awt_ref[kh],
                          preferred_element_type=jnp.float32)           # (tH, K*W)
        if kh == 0:
            acc_ref[...] = contrib
        else:
            acc_ref[...] += contrib

    # Fused LeakyReLU + NCHW store (per output channel; static lane slices).
    for k in range(K):
        v = acc_ref[:, k * W:(k + 1) * W]                       # (tH, W)
        o_ref[0, k] = jnp.where(v > 0, v, neg_slope * v).astype(o_ref.dtype)


# ----------------------------------------------------------------------------
# Grid-invariant tables (hoisted out of the kernel).
# ----------------------------------------------------------------------------
def _build_tables(weight, h, w, H, W):
    K, C, KH, KW = weight.shape
    pad_h, pad_w = KH // 2, KW // 2

    # Row selector with conv halo: srow[p, r] = 1 iff padded row (p - pad_h)
    # is in [0, H) and its nearest source row is r (integer nearest index).
    p = jnp.arange(H + 2 * pad_h)
    yy = p - pad_h
    vr = (yy >= 0) & (yy < H)
    sr = (jnp.clip(yy, 0, H - 1) * h) // H
    srow = (vr[:, None] & (jnp.arange(h)[None, :] == sr[:, None])
            ).astype(jnp.float32)                               # (H+KH-1, h)

    # Per-kw column selectors colsel[kw, s, x] = 1 iff (x + kw - pad_w) in
    # [0, W) and its nearest source column is s; folded with the conv weights:
    #   awt[kh, c*w + s, k*W + x] = sum_kw weight[k, c, kh, kw] * colsel[kw, s, x]
    xs = jnp.arange(W)
    cols = []
    for kw in range(KW):
        xx = xs + kw - pad_w
        vc = (xx >= 0) & (xx < W)
        sc = (jnp.clip(xx, 0, W - 1) * w) // W
        cols.append((vc[None, :] & (jnp.arange(w)[:, None] == sc[None, :])
                     ).astype(jnp.float32))
    colsel = jnp.stack(cols)                                    # (KW, w, W)

    awt = jnp.einsum('ocij,jsx->icsox', weight.astype(jnp.float32), colsel)
    awt = awt.reshape(KH, C * w, K * W)
    return srow, awt


# ----------------------------------------------------------------------------
# Generation-aware VMEM budgets and tile-height picker.
# ----------------------------------------------------------------------------
def _vmem_budgets():
    try:
        cap = int(pltpu.get_tpu_info().vmem_capacity_bytes)
    except Exception:
        cap = 64 * 1024 * 1024          # conservative (v7x-sized) fallback
    tile_budget = min(int(0.40 * cap), 48 * 1024 * 1024)
    vmem_limit = max(32 * 1024 * 1024, min(int(0.80 * cap), 100 * 1024 * 1024))
    return tile_budget, vmem_limit


def _pick_tile_h(H, W, h, Cw, K, KH, N, budget):
    pad_h = KH // 2

    def vmem_bytes(th):
        srow = (H + 2 * pad_h) * h * 4
        xh = h * Cw * 4
        awt = KH * Cw * K * W * 4
        outb = K * th * W * 4
        acc = th * K * W * 4
        rk = th * Cw * 4
        return 2 * (srow + xh + awt + outb) + acc + 2 * rk

    cands = sorted({d for d in range(8, H + 1, 8) if H % d == 0} | {H},
                   reverse=True)
    if N == 1:
        # Prefer >= 2 H-tiles so both TensorCores get work (v7x megacore).
        pref = [d for d in cands if H // d >= 2]
        cands = pref + [d for d in cands if d not in pref]
    for th in cands:
        if vmem_bytes(th) <= budget:
            return th
    # Never fall back to a tile that exceeds the budget when smaller ones exist.
    # TODO(synk): ragged (pl.cdiv) H tiling for H with no multiple-of-8 divisor.
    return min(cands)


# ----------------------------------------------------------------------------
# Wrapper: NCHW in -> NCHW out.
# ----------------------------------------------------------------------------
def upconv2d_leakyrelu_nchw(x, weight, out_hw, *, neg_slope=0.1):
    """x: (N, C, h, w); weight: (K, C, KH, KW) torch OIHW; out_hw: (H, W)."""
    N, C, h, w = x.shape
    K, C2, KH, KW = weight.shape
    assert C2 == C, (C2, C)
    H, W = int(out_hw[0]), int(out_hw[1])
    Cw = C * w

    tile_budget, vmem_limit = _vmem_budgets()
    tH = _pick_tile_h(H, W, h, Cw, K, KH, N, tile_budget)
    nT = H // tH

    srow, awt = _build_tables(weight, h, w, H, W)
    # Small pre-upsample image rearranged to (N, h, C*w) so the row-upsample
    # matmul is batched over all channels (one-time cheap transform).
    xh = jnp.transpose(x.astype(jnp.float32), (0, 2, 1, 3)).reshape(N, h, Cw)

    kernel = functools.partial(_upconv_kernel, tH=tH, W=W, K=K, KH=KH,
                               neg_slope=float(neg_slope))

    flops = 2 * N * KH * (H * h * Cw + H * Cw * K * W)
    bytes_accessed = 4 * (N * h * Cw + N * K * H * W
                          + KH * Cw * K * W + (H + KH - 1) * h)

    return pl.pallas_call(
        kernel,
        out_shape=jax.ShapeDtypeStruct((N, K, H, W), jnp.float32),
        grid_spec=pltpu.PrefetchScalarGridSpec(
            num_scalar_prefetch=0,
            grid=(N, nT),
            in_specs=[
                pl.BlockSpec((KH, Cw, K * W), lambda n, t: (0, 0, 0)),
                pl.BlockSpec((H + 2 * (KH // 2), h), lambda n, t: (0, 0)),
                pl.BlockSpec((1, h, Cw), lambda n, t: (n, 0, 0)),
            ],
            out_specs=pl.BlockSpec((1, K, tH, W), lambda n, t: (n, 0, t, 0)),
            scratch_shapes=[pltpu.VMEM((tH, K * W), jnp.float32)],
        ),
        compiler_params=pltpu.CompilerParams(
            dimension_semantics=("parallel", "parallel"),
            vmem_limit_bytes=int(vmem_limit)),
        cost_estimate=pl.CostEstimate(
            flops=int(flops), transcendentals=0,
            bytes_accessed=int(bytes_accessed)),
    )(awt, srow, xh)


# ----------------------------------------------------------------------------
# UpConv2d module (JAX): nearest upsample -> conv KxK -> LeakyReLU(0.1)
# ----------------------------------------------------------------------------
class UpConv2d:
    def __init__(self, in_channels, out_channels, kernel_size=3, key=None):
        assert kernel_size % 2 == 1
        self.in_channels = in_channels
        self.out_channels = out_channels
        self.kernel_size = kernel_size
        if key is None:
            key = jax.random.PRNGKey(0)
        # PyTorch Conv2d default init (kaiming_uniform, a=sqrt(5)):
        # U(-1/sqrt(fan_in), 1/sqrt(fan_in)), fan_in = C_in * k * k.
        fan_in = in_channels * kernel_size * kernel_size
        bound = 1.0 / math.sqrt(fan_in)
        self.weight = jax.random.uniform(
            key, (out_channels, in_channels, kernel_size, kernel_size),
            dtype=jnp.float32, minval=-bound, maxval=bound)

    def __call__(self, x_nchw, shape):
        """x_nchw: (N, C, h, w); shape: (H, W). Returns (N, K, H, W)."""
        return upconv2d_leakyrelu_nchw(x_nchw, self.weight, shape,
                                       neg_slope=0.1)


# ----------------------------------------------------------------------------
# Pure-JAX reference (correctness check only)
# ----------------------------------------------------------------------------
def _reference(x, weight, out_hw, neg_slope=0.1):
    N, C, h, w = x.shape
    H, W = int(out_hw[0]), int(out_hw[1])
    rows = (jnp.arange(H) * h) // H
    cols = (jnp.arange(W) * w) // W
    up = x[:, :, rows, :][:, :, :, cols]
    pad = weight.shape[-1] // 2
    conv = lax.conv_general_dilated(
        up, weight, window_strides=(1, 1),
        padding=[(pad, pad), (pad, pad)],
        dimension_numbers=("NCHW", "OIHW", "NCHW"))
    return jnp.where(conv > 0, conv, neg_slope * conv)


def _check(N, C_in, C_out, h, w, out_hw, key):
    k_x, k_w = jax.random.split(key)
    x = jax.random.normal(k_x, (N, C_in, h, w), dtype=jnp.float32)
    block = UpConv2d(C_in, C_out, kernel_size=3, key=k_w)

    out = jax.block_until_ready(block(x, out_hw))
    assert out.shape == (N, C_out, out_hw[0], out_hw[1]), out.shape

    ref = jax.block_until_ready(_reference(x, block.weight, out_hw))
    err = float(jnp.max(jnp.abs(out - ref)))
    assert jnp.allclose(out, ref, atol=1e-4, rtol=1e-4), err


if __name__ == "__main__":
    key = jax.random.PRNGKey(0)
    k1, k2 = jax.random.split(key)

    # Primary small shape implied by the module (2x nearest upsample).
    _check(N=2, C_in=4, C_out=8, h=16, w=16, out_hw=(32, 32), key=k1)

    # Odd / non-aligned shapes and a non-integer scale factor.
    _check(N=1, C_in=3, C_out=5, h=7, w=9, out_hw=(15, 20), key=k2)

    print("KERNEL_OK")
</pallas_src>

<mosaic_0001>
module attributes {stable_mosaic.version = 11 : i64} {
  func.func @_upconv_kernel(%arg0: i32, %arg1: i32, %arg2: memref<3x64x256xf32, #tpu.memory_space<vmem>>, %arg3: memref<34x16xf32, #tpu.memory_space<vmem>>, %arg4: memref<1x16x64xf32, #tpu.memory_space<vmem>>, %arg5: memref<1x8x32x32xf32, #tpu.memory_space<vmem>>, %arg6: memref<32x256xf32, #tpu.memory_space<vmem>>) attributes {dimension_semantics = [#tpu.dimension_semantics<parallel>, #tpu.dimension_semantics<parallel>], iteration_bounds = array<i64: 2, 1>, scalar_prefetch = 0 : i64, scratch_operands = 1 : i64, tpu.core_type = #tpu.core_type<tc>, window_params = [{pipeline_mode = #tpu.pipeline_mode<synchronous>, transform_indices = @transform_0, window_bounds = array<i64: 3, 64, 256>}, {pipeline_mode = #tpu.pipeline_mode<synchronous>, transform_indices = @transform_1, window_bounds = array<i64: 34, 16>}, {transform_indices = @transform_2, window_bounds = array<i64: 1, 16, 64>}, {transform_indices = @transform_3, window_bounds = array<i64: 1, 8, 32, 32>}]} {
    %c32_i32 = arith.constant 32 : i32
    %0 = arith.muli %arg1, %c32_i32 : i32
    %c0 = arith.constant 0 : index
    %c0_0 = arith.constant 0 : index
    %c0_1 = arith.constant 0 : index
    %1 = vector.load %arg4[%c0, %c0_0, %c0_1] : memref<1x16x64xf32, #tpu.memory_space<vmem>>, vector<1x16x64xf32>
    %2 = vector.shape_cast %1 : vector<1x16x64xf32> to vector<16x64xf32>
    %c0_i32 = arith.constant 0 : i32
    %3 = arith.addi %0, %c0_i32 : i32
    %4 = arith.index_cast %3 : i32 to index
    %c0_2 = arith.constant 0 : index
    %5 = vector.load %arg3[%4, %c0_2] : memref<34x16xf32, #tpu.memory_space<vmem>>, vector<32x16xf32>
    %cst = arith.constant dense<0.000000e+00> : vector<32x64xf32>
    %6 = tpu.matmul %5, %2, %cst {dimension_numbers = #tpu.dot_dimension_numbers<[1], [0], [0], [1], [0, 0, 1, 1], [], []>} : vector<32x16xf32>, vector<16x64xf32>, vector<32x64xf32> -> vector<32x64xf32>
    %c0_3 = arith.constant 0 : index
    %c0_4 = arith.constant 0 : index
    %c0_5 = arith.constant 0 : index
    %7 = vector.load %arg2[%c0_3, %c0_4, %c0_5] : memref<3x64x256xf32, #tpu.memory_space<vmem>>, vector<1x64x256xf32>
    %8 = vector.shape_cast %7 : vector<1x64x256xf32> to vector<64x256xf32>
    %cst_6 = arith.constant dense<0.000000e+00> : vector<32x256xf32>
    %9 = tpu.matmul %6, %8, %cst_6 {dimension_numbers = #tpu.dot_dimension_numbers<[1], [0], [0], [1], [0, 0, 1, 1], [], []>} : vector<32x64xf32>, vector<64x256xf32>, vector<32x256xf32> -> vector<32x256xf32>
    %c0_7 = arith.constant 0 : index
    %c0_8 = arith.constant 0 : index
    %10 = vector.load %arg6[%c0_7, %c0_8] : memref<32x256xf32, #tpu.memory_space<vmem>>, vector<32x256xf32>
    tpu.vector_store %arg6[%c0_7, %c0_8], %9 {strides = array<i32>} : memref<32x256xf32, #tpu.memory_space<vmem>>, vector<32x256xf32>,
    %c1_i32 = arith.constant 1 : i32
    %11 = arith.addi %0, %c1_i32 : i32
    %12 = arith.index_cast %11 : i32 to index
    %c0_9 = arith.constant 0 : index
    %13 = vector.load %arg3[%12, %c0_9] : memref<34x16xf32, #tpu.memory_space<vmem>>, vector<32x16xf32>
    %cst_10 = arith.constant dense<0.000000e+00> : vector<32x64xf32>
    %14 = tpu.matmul %13, %2, %cst_10 {dimension_numbers = #tpu.dot_dimension_numbers<[1], [0], [0], [1], [0, 0, 1, 1], [], []>} : vector<32x16xf32>, vector<16x64xf32>, vector<32x64xf32> -> vector<32x64xf32>
    %c1 = arith.constant 1 : index
    %c0_11 = arith.constant 0 : index
    %c0_12 = arith.constant 0 : index
    %15 = vector.load %arg2[%c1, %c0_11, %c0_12] : memref<3x64x256xf32, #tpu.memory_space<vmem>>, vector<1x64x256xf32>
    %16 = vector.shape_cast %15 : vector<1x64x256xf32> to vector<64x256xf32>
    %cst_13 = arith.constant dense<0.000000e+00> : vector<32x256xf32>
    %17 = tpu.matmul %14, %16, %cst_13 {dimension_numbers = #tpu.dot_dimension_numbers<[1], [0], [0], [1], [0, 0, 1, 1], [], []>} : vector<32x64xf32>, vector<64x256xf32>, vector<32x256xf32> -> vector<32x256xf32>
    %c0_14 = arith.constant 0 : index
    %c0_15 = arith.constant 0 : index
    %18 = vector.load %arg6[%c0_14, %c0_15] : memref<32x256xf32, #tpu.memory_space<vmem>>, vector<32x256xf32>
    %19 = arith.addf %18, %17 : vector<32x256xf32>
    %c0_16 = arith.constant 0 : index
    %c0_17 = arith.constant 0 : index
    %20 = vector.load %arg6[%c0_16, %c0_17] : memref<32x256xf32, #tpu.memory_space<vmem>>, vector<32x256xf32>
    tpu.vector_store %arg6[%c0_16, %c0_17], %19 {strides = array<i32>} : memref<32x256xf32, #tpu.memory_space<vmem>>, vector<32x256xf32>,
    %c2_i32 = arith.constant 2 : i32
    %21 = arith.addi %0, %c2_i32 : i32
    %22 = arith.index_cast %21 : i32 to index
    %c0_18 = arith.constant 0 : index
    %23 = vector.load %arg3[%22, %c0_18] : memref<34x16xf32, #tpu.memory_space<vmem>>, vector<32x16xf32>
    %cst_19 = arith.constant dense<0.000000e+00> : vector<32x64xf32>
    %24 = tpu.matmul %23, %2, %cst_19 {dimension_numbers = #tpu.dot_dimension_numbers<[1], [0], [0], [1], [0, 0, 1, 1], [], []>} : vector<32x16xf32>, vector<16x64xf32>, vector<32x64xf32> -> vector<32x64xf32>
    %c2 = arith.constant 2 : index
    %c0_20 = arith.constant 0 : index
    %c0_21 = arith.constant 0 : index
    %25 = vector.load %arg2[%c2, %c0_20, %c0_21] : memref<3x64x256xf32, #tpu.memory_space<vmem>>, vector<1x64x256xf32>
    %26 = vector.shape_cast %25 : vector<1x64x256xf32> to vector<64x256xf32>
    %cst_22 = arith.constant dense<0.000000e+00> : vector<32x256xf32>
    %27 = tpu.matmul %24, %26, %cst_22 {dimension_numbers = #tpu.dot_dimension_numbers<[1], [0], [0], [1], [0, 0, 1, 1], [], []>} : vector<32x64xf32>, vector<64x256xf32>, vector<32x256xf32> -> vector<32x256xf32>
    %c0_23 = arith.constant 0 : index
    %c0_24 = arith.constant 0 : index
    %28 = vector.load %arg6[%c0_23, %c0_24] : memref<32x256xf32, #tpu.memory_space<vmem>>, vector<32x256xf32>
    %29 = arith.addf %28, %27 : vector<32x256xf32>
    %c0_25 = arith.constant 0 : index
    %c0_26 = arith.constant 0 : index
    %30 = vector.load %arg6[%c0_25, %c0_26] : memref<32x256xf32, #tpu.memory_space<vmem>>, vector<32x256xf32>
    tpu.vector_store %arg6[%c0_25, %c0_26], %29 {strides = array<i32>} : memref<32x256xf32, #tpu.memory_space<vmem>>, vector<32x256xf32>,
    %c0_27 = arith.constant 0 : index
    %c0_28 = arith.constant 0 : index
    %31 = vector.load %arg6[%c0_27, %c0_28] : memref<32x256xf32, #tpu.memory_space<vmem>>, vector<32x32xf32>
    %cst_29 = arith.constant 0.000000e+00 : f32
    %32 = vector.broadcast %cst_29 : f32 to vector<32x32xf32>
    %33 = arith.cmpf ogt, %31, %32 : vector<32x32xf32>
    %cst_30 = arith.constant 1.000000e-01 : f32
    %34 = vector.broadcast %cst_30 : f32 to vector<32x32xf32>
    %35 = arith.mulf %34, %31 : vector<32x32xf32>
    %36 = arith.select %33, %31, %35 : vector<32x32xi1>, vector<32x32xf32>
    %c0_31 = arith.constant 0 : index
    %c0_32 = arith.constant 0 : index
    %c0_33 = arith.constant 0 : index
    %c0_34 = arith.constant 0 : index
    %37 = vector.load %arg5[%c0_31, %c0_32, %c0_33, %c0_34] : memref<1x8x32x32xf32, #tpu.memory_space<vmem>>, vector<1x1x32x32xf32>
    %38 = vector.shape_cast %37 : vector<1x1x32x32xf32> to vector<32x32xf32>
    %39 = vector.shape_cast %36 : vector<32x32xf32> to vector<1x1x32x32xf32>
    tpu.vector_store %arg5[%c0_31, %c0_32, %c0_33, %c0_34], %39 {strides = array<i32>} : memref<1x8x32x32xf32, #tpu.memory_space<vmem>>, vector<1x1x32x32xf32>,
    %c0_35 = arith.constant 0 : index
    %c32 = arith.constant 32 : index
    %40 = vector.load %arg6[%c0_35, %c32] : memref<32x256xf32, #tpu.memory_space<vmem>>, vector<32x32xf32>
    %cst_36 = arith.constant 0.000000e+00 : f32
    %41 = vector.broadcast %cst_36 : f32 to vector<32x32xf32>
    %42 = arith.cmpf ogt, %40, %41 : vector<32x32xf32>
    %cst_37 = arith.constant 1.000000e-01 : f32
    %43 = vector.broadcast %cst_37 : f32 to vector<32x32xf32>
    %44 = arith.mulf %43, %40 : vector<32x32xf32>
    %45 = arith.select %42, %40, %44 : vector<32x32xi1>, vector<32x32xf32>
    %c0_38 = arith.constant 0 : index
    %c1_39 = arith.constant 1 : index
    %c0_40 = arith.constant 0 : index
    %c0_41 = arith.constant 0 : index
    %46 = vector.load %arg5[%c0_38, %c1_39, %c0_40, %c0_41] : memref<1x8x32x32xf32, #tpu.memory_space<vmem>>, vector<1x1x32x32xf32>
    %47 = vector.shape_cast %46 : vector<1x1x32x32xf32> to vector<32x32xf32>
    %48 = vector.shape_cast %45 : vector<32x32xf32> to vector<1x1x32x32xf32>
    tpu.vector_store %arg5[%c0_38, %c1_39, %c0_40, %c0_41], %48 {strides = array<i32>} : memref<1x8x32x32xf32, #tpu.memory_space<vmem>>, vector<1x1x32x32xf32>,
    %c0_42 = arith.constant 0 : index
    %c64 = arith.constant 64 : index
    %49 = vector.load %arg6[%c0_42, %c64] : memref<32x256xf32, #tpu.memory_space<vmem>>, vector<32x32xf32>
    %cst_43 = arith.constant 0.000000e+00 : f32
    %50 = vector.broadcast %cst_43 : f32 to vector<32x32xf32>
    %51 = arith.cmpf ogt, %49, %50 : vector<32x32xf32>
    %cst_44 = arith.constant 1.000000e-01 : f32
    %52 = vector.broadcast %cst_44 : f32 to vector<32x32xf32>
    %53 = arith.mulf %52, %49 : vector<32x32xf32>
    %54 = arith.select %51, %49, %53 : vector<32x32xi1>, vector<32x32xf32>
    %c0_45 = arith.constant 0 : index
    %c2_46 = arith.constant 2 : index
    %c0_47 = arith.constant 0 : index
    %c0_48 = arith.constant 0 : index
    %55 = vector.load %arg5[%c0_45, %c2_46, %c0_47, %c0_48] : memref<1x8x32x32xf32, #tpu.memory_space<vmem>>, vector<1x1x32x32xf32>
    %56 = vector.shape_cast %55 : vector<1x1x32x32xf32> to vector<32x32xf32>
    %57 = vector.shape_cast %54 : vector<32x32xf32> to vector<1x1x32x32xf32>
    tpu.vector_store %arg5[%c0_45, %c2_46, %c0_47, %c0_48], %57 {strides = array<i32>} : memref<1x8x32x32xf32, #tpu.memory_space<vmem>>, vector<1x1x32x32xf32>,
    %c0_49 = arith.constant 0 : index
    %c96 = arith.constant 96 : index
    %58 = vector.load %arg6[%c0_49, %c96] : memref<32x256xf32, #tpu.memory_space<vmem>>, vector<32x32xf32>
    %cst_50 = arith.constant 0.000000e+00 : f32
    %59 = vector.broadcast %cst_50 : f32 to vector<32x32xf32>
    %60 = arith.cmpf ogt, %58, %59 : vector<32x32xf32>
    %cst_51 = arith.constant 1.000000e-01 : f32
    %61 = vector.broadcast %cst_51 : f32 to vector<32x32xf32>
    %62 = arith.mulf %61, %58 : vector<32x32xf32>
    %63 = arith.select %60, %58, %62 : vector<32x32xi1>, vector<32x32xf32>
    %c0_52 = arith.constant 0 : index
    %c3 = arith.constant 3 : index
    %c0_53 = arith.constant 0 : index
    %c0_54 = arith.constant 0 : index
    %64 = vector.load %arg5[%c0_52, %c3, %c0_53, %c0_54] : memref<1x8x32x32xf32, #tpu.memory_space<vmem>>, vector<1x1x32x32xf32>
    %65 = vector.shape_cast %64 : vector<1x1x32x32xf32> to vector<32x32xf32>
    %66 = vector.shape_cast %63 : vector<32x32xf32> to vector<1x1x32x32xf32>
    tpu.vector_store %arg5[%c0_52, %c3, %c0_53, %c0_54], %66 {strides = array<i32>} : memref<1x8x32x32xf32, #tpu.memory_space<vmem>>, vector<1x1x32x32xf32>,
    %c0_55 = arith.constant 0 : index
    %c128 = arith.constant 128 : index
    %67 = vector.load %arg6[%c0_55, %c128] : memref<32x256xf32, #tpu.memory_space<vmem>>, vector<32x32xf32>
    %cst_56 = arith.constant 0.000000e+00 : f32
    %68 = vector.broadcast %cst_56 : f32 to vector<32x32xf32>
    %69 = arith.cmpf ogt, %67, %68 : vector<32x32xf32>
    %cst_57 = arith.constant 1.000000e-01 : f32
    %70 = vector.broadcast %cst_57 : f32 to vector<32x32xf32>
    %71 = arith.mulf %70, %67 : vector<32x32xf32>
    %72 = arith.select %69, %67, %71 : vector<32x32xi1>, vector<32x32xf32>
    %c0_58 = arith.constant 0 : index
    %c4 = arith.constant 4 : index
    %c0_59 = arith.constant 0 : index
    %c0_60 = arith.constant 0 : index
    %73 = vector.load %arg5[%c0_58, %c4, %c0_59, %c0_60] : memref<1x8x32x32xf32, #tpu.memory_space<vmem>>, vector<1x1x32x32xf32>
    %74 = vector.shape_cast %73 : vector<1x1x32x32xf32> to vector<32x32xf32>
    %75 = vector.shape_cast %72 : vector<32x32xf32> to vector<1x1x32x32xf32>
    tpu.vector_store %arg5[%c0_58, %c4, %c0_59, %c0_60], %75 {strides = array<i32>} : memref<1x8x32x32xf32, #tpu.memory_space<vmem>>, vector<1x1x32x32xf32>,
    %c0_61 = arith.constant 0 : index
    %c160 = arith.constant 160 : index
    %76 = vector.load %arg6[%c0_61, %c160] : memref<32x256xf32, #tpu.memory_space<vmem>>, vector<32x32xf32>
    %cst_62 = arith.constant 0.000000e+00 : f32
    %77 = vector.broadcast %cst_62 : f32 to vector<32x32xf32>
    %78 = arith.cmpf ogt, %76, %77 : vector<32x32xf32>
    %cst_63 = arith.constant 1.000000e-01 : f32
    %79 = vector.broadcast %cst_63 : f32 to vector<32x32xf32>
    %80 = arith.mulf %79, %76 : vector<32x32xf32>
    %81 = arith.select %78, %76, %80 : vector<32x32xi1>, vector<32x32xf32>
    %c0_64 = arith.constant 0 : index
    %c5 = arith.constant 5 : index
    %c0_65 = arith.constant 0 : index
    %c0_66 = arith.constant 0 : index
    %82 = vector.load %arg5[%c0_64, %c5, %c0_65, %c0_66] : memref<1x8x32x32xf32, #tpu.memory_space<vmem>>, vector<1x1x32x32xf32>
    %83 = vector.shape_cast %82 : vector<1x1x32x32xf32> to vector<32x32xf32>
    %84 = vector.shape_cast %81 : vector<32x32xf32> to vector<1x1x32x32xf32>
    tpu.vector_store %arg5[%c0_64, %c5, %c0_65, %c0_66], %84 {strides = array<i32>} : memref<1x8x32x32xf32, #tpu.memory_space<vmem>>, vector<1x1x32x32xf32>,
    %c0_67 = arith.constant 0 : index
    %c192 = arith.constant 192 : index
    %85 = vector.load %arg6[%c0_67, %c192] : memref<32x256xf32, #tpu.memory_space<vmem>>, vector<32x32xf32>
    %cst_68 = arith.constant 0.000000e+00 : f32
    %86 = vector.broadcast %cst_68 : f32 to vector<32x32xf32>
    %87 = arith.cmpf ogt, %85, %86 : vector<32x32xf32>
    %cst_69 = arith.constant 1.000000e-01 : f32
    %88 = vector.broadcast %cst_69 : f32 to vector<32x32xf32>
    %89 = arith.mulf %88, %85 : vector<32x32xf32>
    %90 = arith.select %87, %85, %89 : vector<32x32xi1>, vector<32x32xf32>
    %c0_70 = arith.constant 0 : index
    %c6 = arith.constant 6 : index
    %c0_71 = arith.constant 0 : index
    %c0_72 = arith.constant 0 : index
    %91 = vector.load %arg5[%c0_70, %c6, %c0_71, %c0_72] : memref<1x8x32x32xf32, #tpu.memory_space<vmem>>, vector<1x1x32x32xf32>
    %92 = vector.shape_cast %91 : vector<1x1x32x32xf32> to vector<32x32xf32>
    %93 = vector.shape_cast %90 : vector<32x32xf32> to vector<1x1x32x32xf32>
    tpu.vector_store %arg5[%c0_70, %c6, %c0_71, %c0_72], %93 {strides = array<i32>} : memref<1x8x32x32xf32, #tpu.memory_space<vmem>>, vector<1x1x32x32xf32>,
    %c0_73 = arith.constant 0 : index
    %c224 = arith.constant 224 : index
    %94 = vector.load %arg6[%c0_73, %c224] : memref<32x256xf32, #tpu.memory_space<vmem>>, vector<32x32xf32>
    %cst_74 = arith.constant 0.000000e+00 : f32
    %95 = vector.broadcast %cst_74 : f32 to vector<32x32xf32>
    %96 = arith.cmpf ogt, %94, %95 : vector<32x32xf32>
    %cst_75 = arith.constant 1.000000e-01 : f32
    %97 = vector.broadcast %cst_75 : f32 to vector<32x32xf32>
    %98 = arith.mulf %97, %94 : vector<32x32xf32>
    %99 = arith.select %96, %94, %98 : vector<32x32xi1>, vector<32x32xf32>
    %c0_76 = arith.constant 0 : index
    %c7 = arith.constant 7 : index
    %c0_77 = arith.constant 0 : index
    %c0_78 = arith.constant 0 : index
    %100 = vector.load %arg5[%c0_76, %c7, %c0_77, %c0_78] : memref<1x8x32x32xf32, #tpu.memory_space<vmem>>, vector<1x1x32x32xf32>
    %101 = vector.shape_cast %100 : vector<1x1x32x32xf32> to vector<32x32xf32>
    %102 = vector.shape_cast %99 : vector<32x32xf32> to vector<1x1x32x32xf32>
    tpu.vector_store %arg5[%c0_76, %c7, %c0_77, %c0_78], %102 {strides = array<i32>} : memref<1x8x32x32xf32, #tpu.memory_space<vmem>>, vector<1x1x32x32xf32>,
    return
  }
  func.func @transform_0(%arg0: i32, %arg1: i32) -> (i32, i32, i32) {
    %c0_i32 = arith.constant 0 : i32
    %c0_i32_0 = arith.constant 0 : i32
    %c0_i32_1 = arith.constant 0 : i32
    %c0_i32_2 = arith.constant 0 : i32
    return %c0_i32, %c0_i32_0, %c0_i32_1 : i32, i32, i32
  }
  func.func @transform_1(%arg0: i32, %arg1: i32) -> (i32, i32) {
    %c0_i32 = arith.constant 0 : i32
    %c0_i32_0 = arith.constant 0 : i32
    %c0_i32_1 = arith.constant 0 : i32
    return %c0_i32, %c0_i32_0 : i32, i32
  }
  func.func @transform_2(%arg0: i32, %arg1: i32) -> (i32, i32, i32) {
    %c0_i32 = arith.constant 0 : i32
    %c0_i32_0 = arith.constant 0 : i32
    %c0_i32_1 = arith.constant 0 : i32
    return %arg0, %c0_i32, %c0_i32_0 : i32, i32, i32
  }
  func.func @transform_3(%arg0: i32, %arg1: i32) -> (i32, i32, i32, i32) {
    %c0_i32 = arith.constant 0 : i32
    %c0_i32_0 = arith.constant 0 : i32
    %c0_i32_1 = arith.constant 0 : i32
    return %arg0, %c0_i32, %arg1, %c0_i32_0 : i32, i32, i32, i32
  }
}

</mosaic_0001>

<bundles_post_ra>
// kernel: tpu_custom_call.1
= control target key start
LH: loop header
LB: loop body
LE: loop exit
PB: predicated region body
PF: predicated region fallthrough
CT: control target
= control target key end

     0   :  { %8 = vsyncpa [#allocation4], 0  ;;  %s2060_s0 = inlined_call_operand.hbm [shape: f32[3,64,256], index: 0, kind: input, shape index: {}]   ;;  %s2061_s1 = inlined_call_operand.vmem [shape: f32[34,16], index: 1, kind: input, shape index: {}]   ;;  %s2062_s2 = inlined_call_operand.vmem [shape: f32[2,16,64], index: 2, kind: input, shape index: {}]   ;;  %s2063_s3 = inlined_call_operand.hbm [shape: f32[2,8,32,32], index: 3, kind: output, shape index: {}]  }
   0x1   :  { %9 = vsyncpa [#allocation5], 0 }
   0x2   :  { %11 = vsyncpa [#allocation5 + $0x1], 0  ;;  %s1711_s12 = smov 0   ;;  %s1713_s13 = smov 0  }
   0x3   :  { %s1715_s14 = smov 0   ;;  %s1717_s15 = smov 0  }
   0x4   :  { %s1719_s16 = smov 0   ;;  %s1721_s17 = smov 0  }
   0x5 LB: > { %s1294_s18 = sadd.s32 4294967295, %s1679_s17   ;;  %s1295_s19 = sadd.s32 4294967294, %s1679_s17   ;;  %s1679_s17 = sphi %s1721_s17, %s17_s17   ;;  %s1675_s16 = sphi %s1719_s16, %s2081_s16   ;;  %s1671_s15 = sphi %s1717_s15, %s2080_s15   ;;  %s1667_s14 = sphi %s1715_s14, %s2079_s14   ;;  %s1663_s13 = sphi %s1713_s13, %s2078_s13   ;;  %s1659_s12 = sphi %s1711_s12, %s2077_s12  }
   0x6   : > { %s29_s20 = sadd.s32 1, %s1675_s16  ;;  %s106_s21 = sadd.s32 1, %s1667_s14 }
   0x7   : > { %p31_p0 = scmp.ge.s32.totalorder %s29_s20, 2  ;;  %p116_p1 = scmp.ne.s32.totalorder %s1667_s14, %s1663_s13 }
   0x8   : > { %p117_p2 = scmp.eq.s32.totalorder %s1294_s18, 1  ;;  %p122_p3 = scmp.ne.s32.totalorder %s1663_s13, %s1659_s12 }
   0x9   : > { %s2083_s20 = smov (%p31_p0, %s29_s20), 0  ;;  %p123_p5 = scmp.eq.s32.totalorder %s1295_s19, 1 }
   0xa   : > { %p1751_p4 = por %p117_p2, %p116_p1  ;;  %s101_s23 = ssub.s32 %s1675_s16, %s2083_s20 }
   0xb   : > { %p1296_p6 = scmp.ge.s32.totalorder %s1679_s17, 1  ;;  %p104_p7 = scmp.eq.s32.totalorder %s101_s23, 0 }
   0xc   : > { %s2068_s22 = scalar_select %p1751_p4, 1, 0 }
   0xd   : > { %p1758_p8 = por %p123_p5, %p122_p3  ;;  %p130_p9 = scmp.lt.s32.totalorder %s1679_s17, 3 }
   0xe   : > { %s1764_s25 = scalar_select %p104_p7, %s1667_s14, %s106_s21  }
   0xf   : > { %s2069_s24 = scalar_select %p1758_p8, 1, 0 }
  0x10   : > { %p1766_p10 = pnand %p1296_p6, %p130_p9  ;;  %p1770_p11 = scmp.eq.s32.totalorder %s1294_s18, 0 }
  0x11   : > { %s1681_s28 = smov [#allocation3]   ;;  %s1569_s6 = scalar_lea.hbm %s2060_s0, 6144 }
  0x12   : > { %s2070_s26 = scalar_select %p1766_p10, 1, 0 }
  0x13   : > { %s2071_s27 = scalar_select %p1770_p11, 1, 0 }
  0x14   : > { %p1501_p12 = pneg %p1766_p10  ;;  %s142_s29 = sshll.u32 %s1681_s28, 4  ;;  %s143_s29 = int_to_ptr.vmem [resolvable:$true] %s142_s29 }
  0x15   : > { %p1570_p0 = scmp.ne.s32.totalorder %s2060_s0, %s1569_s6  ;;  %p1576_p5 = scmp.lt.u32.totalorder %s1569_s6, %s2060_s0 }
  0x16   : > { %p1778_p13 = pnand %p1770_p11, %p1501_p12 }
  0x18   : > { %p1571_p1 = pneg %p1778_p13 }
  0x1a   : > { %p1572_p2 = pnand %p1571_p1, %p1570_p0 }
  0x1c   : > { %p1573_p3 = pneg %p1572_p2 }
  0x1e   : > { %p1578_p6 = pnand %p1576_p5, %p1573_p3 }
  0x20   : > { %1581 = shalt.err (!%p1578_p6)
}
  0x21   : > { %s1582_s11 = scalar_lea.vmem %s143_s29, 6144  ;;  %p1590_p8 = scmp.lt.s32.totalorder %s143_s29, %s143_s29 }
  0x22   : > { %p1583_p7 = scmp.ne.s32.totalorder %s143_s29, %s1582_s11  ;;  %p1591_p4 = scmp.lt.s32.totalorder %s1582_s11, %s1582_s11 }
  0x24   : > { %p1585_p9 = pnand %p1583_p7, %p1571_p1  ;;  %p1592_p11 = por %p1591_p4, %p1590_p8 }
  0x26   : > { %p1586_p12 = pneg %p1585_p9 }
  0x28   : > { %p1593_p10 = pnand %p1592_p11, %p1586_p12 }
  0x2a   : > { %1596 = shalt.err (!%p1593_p10)
}
  0x2b   : > { %s1682_s18 = smov 256   ;;  %s1683_s19 = smov 16  }
  0x2c   : > { %1504 = dma.hbm_to_vmem [thread:$0]  (!%p1778_p13), %s2060_s0, 6144, %s143_s29, [#allocation4], %s1682_s18, %s1682_s18, %s1683_s19  }
  0x2d   : > { %p2073_p0 = scmp.ne.s32.totalorder %s2070_s26, 0 }
  0x2e   : > { %p2074_p2 = scmp.ne.s32.totalorder (!%p2073_p0), %s2071_s27, 0 }
  0x2f   : > { %169 = sbr.rel (%p2073_p0) target bundleno = 921 (0x399), region = 32 }
  0x36   : > { %1650 = dma.done.wait (%p2074_p2), [#allocation4], 6144  }
  0x37   : > { %1652 = vsyncadd (%p2074_p2), [#allocation4], 4294961152  ;;  %p193_p4 = scmp.lt.s32.totalorder %s1671_s15, 1  ;;  %vm207_vm0 = vcmask 130048   ;;  %v203_v2 = vld [vmem:[%s2061_s1] sm:$0xff]  ;;  %v306_v4 = vld [vmem:[#allocation3 + $0x8] sm:$0xff] }
  0x38   : > { %1393 = vmatprep.mubr.msk.f32.mxu0 %vm207_vm0, %v203_v2  ;;  %v308_v5 = vld [vmem:[#allocation3 + $0x18] sm:$0xff]  ;;  %v305_v6 = vld [vmem:[#allocation3] sm:$0xff]  ;;  %v307_v8 = vld [vmem:[#allocation3 + $0x10] sm:$0xff]  ;;  %v1684_v31 = vmov 0.0   ;;  %vm321_vm1 = vcmask 523264   ;;  %s190_s11 = sand.u32 1, %s1663_s13  }
  0x39   : > { %s194_s28 = scalar_select %p193_p4, %s1671_s15, 1  ;;  %v1423_v7 = vpack.c.bf16 %v308_v5, %v306_v4  ;;  %v310_v9 = vld [vmem:[#allocation3 + $0x28] sm:$0xff]  ;;  %v312_v10 = vld [vmem:[#allocation3 + $0x38] sm:$0xff]  ;;  %v1425_v12 = vpack.c.bf16 %v307_v8, %v305_v6  ;;  %v205_v13 = vld [vmem:[%s2061_s1 + $0x10] sm:$0xff]  ;;  %627 = vmatprep.mubr.f32.mxu1 %v1684_v31  ;;  %vm937_vm3 = vcmask 261120  }
  0x3a   : > { %v204_v11 = vld [vmem:[%s2061_s1 + $0x8] sm:$0xff]  ;;  %v1427_v14 = vpack.c.bf16 %v312_v10, %v310_v9  ;;  %v309_v15 = vld [vmem:[#allocation3 + $0x20] sm:$0xff]  ;;  %v311_v16 = vld [vmem:[#allocation3 + $0x30] sm:$0xff]  ;;  %s1301_s18 = sshll.u32 %s190_s11, 8  ;;  %s1685_s19 = smov 96  }
  0x3b   : > { %s1369_s4 = sshll.u32 %s194_s28, 4  ;;  %v314_v17 = vld [vmem:[#allocation3 + $0x48] sm:$0xff]  ;;  %v316_v18 = vld [vmem:[#allocation3 + $0x58] sm:$0xff]  ;;  %v1429_v20 = vpack.c.bf16 %v311_v16, %v309_v15  ;;  %v313_v22 = vld [vmem:[#allocation3 + $0x40] sm:$0xff]  ;;  %s1910_s21 = scalar_lea.vmem [#allocation6], %s1301_s18 }
  0x3c   : > { %s197_s6 = scalar_lea.vmem %s2062_s2, %s1369_s4  ;;  %v206_v19 = vld [vmem:[%s2061_s1 + $0x18] sm:$0xff]  ;;  %v1431_v21 = vpack.c.bf16 %v316_v18, %v314_v17  ;;  %v315_v23 = vld [vmem:[#allocation3 + $0x50] sm:$0xff]  ;;  %v318_v24 = vld [vmem:[#allocation3 + $0x68] sm:$0xff]  ;;  %s1686_s23 = smov 64  }
  0x3d   : > { %v200_v0 = vld [vmem:[%s197_s6] sm:$0xff]  ;;  %v201_v1 = vld [vmem:[%s197_s6 + $0x8] sm:$0xff]  ;;  %v320_v25 = vld [vmem:[#allocation3 + $0x78] sm:$0xff]  ;;  %v1433_v26 = vpack.c.bf16 %v315_v23, %v313_v22  ;;  %s1687_s28 = smov 32   ;;  %s1370_s4 = sshll.u32 %s1671_s15, 12 }
  0x3e   : > { %v1812_v3 = vpack.c.bf16 %v201_v1, %v200_v0  ;;  %v1435_v27 = vpack.c.bf16 %v320_v25, %v318_v24  ;;  %v317_v28 = vld [vmem:[#allocation3 + $0x60] sm:$0xff]  ;;  %v319_v29 = vld [vmem:[#allocation3 + $0x70] sm:$0xff]  ;;  %v536_v44 = vld [vmem:[#allocation3 + $0x88] sm:$0xff]  ;;  %s1201_s5 = sshll.u32 %s1910_s21, 4  ;;  %s2006_s26 = scalar_lea.hbm %s2063_s3, %s1370_s4  ;;  %s2008_s5 = int_to_ptr.vmem [resolvable:$true] %s1201_s5 }
  0x3f   : > { %v1437_v30 = vpack.c.bf16 %v319_v29, %v317_v28  ;;  %v1312_v36 = vld [vmem:[%s2061_s1 + $0x1] sm:$0xff]  ;;  %v1313_v37 = vld [vmem:[%s2061_s1 + $0x9] sm:$0xff]  ;;  %v1314_v38 = vld [vmem:[%s2061_s1 + $0x11] sm:$0xff]  ;;  %s2014_s15 = scalar_lea.sflag [#allocation5], %s190_s11  ;;  %s1597_s29 = scalar_lea.vmem %s2008_s5, 4096 }
  0x40   : > { %1420 = vmatprep.subr.bf16.mxu0 %v1812_v3  ;;  %v1315_v39 = vld [vmem:[%s2061_s1 + $0x19] sm:$0xff]  ;;  %v1324_v40 = vld [vmem:[%s2061_s1 + $0x2] sm:$0xff]  ;;  %v1325_v41 = vld [vmem:[%s2061_s1 + $0xa] sm:$0xff]  ;;  %p1598_p8 = scmp.ne.s32.totalorder %s2008_s5, %s1597_s29  ;;  %p2075_p10 = scmp.ne.s32.totalorder %s2068_s22, 0 }
  0x41   : > { %1422 = vmatpush3.bf16.msra.mxu0 %v1812_v3  ;;  %v1326_v42 = vld [vmem:[%s2061_s1 + $0x12] sm:$0xff]  ;;  %v1327_v43 = vld [vmem:[%s2061_s1 + $0x1a] sm:$0xff]  ;;  %v540_v50 = vld [vmem:[#allocation3 + $0xa8] sm:$0xff]  ;;  %s1688_s27 = smov [#allocation6]  }
  0x42   : > { %1424 = vmatprep.subr.bf16.mxu0 %v1423_v7  ;;  %v538_v45 = vld [vmem:[#allocation3 + $0x98] sm:$0xff]  ;;  %v535_v47 = vld [vmem:[#allocation3 + $0x80] sm:$0xff]  ;;  %v537_v48 = vld [vmem:[#allocation3 + $0x90] sm:$0xff]  ;;  %p1599_p11 = pnand %p1598_p8, %p2075_p10  ;;  %s1601_s7 = sshll.u32 %s1688_s27, 4  ;;  %s1602_s7 = int_to_ptr.vmem [resolvable:$false] %s1601_s7 }
  0x43   : > { %v1443_v46 = vpack.c.bf16 %v538_v45, %v536_v44  ;;  %v1445_v49 = vpack.c.bf16 %v537_v48, %v535_v47  ;;  %v542_v51 = vld [vmem:[#allocation3 + $0xb8] sm:$0xff]  ;;  %v539_v53 = vld [vmem:[#allocation3 + $0xa0] sm:$0xff]  ;;  %v541_v54 = vld [vmem:[#allocation3 + $0xb0] sm:$0xff]  ;;  %s1603_s8 = scalar_lea.vmem %s1602_s7, 8192  ;;  %p1604_p1 = scmp.lt.s32.totalorder %s2008_s5, %s1602_s7 }
  0x44   : > { %1394 = vmatmul.mubr.msk.f32.vlgmr.msra.gmra.mrb[0].mxu0 %vm207_vm0, %v204_v11  ;;  %v1447_v52 = vpack.c.bf16 %v542_v51, %v540_v50  ;;  %v1449_v55 = vpack.c.bf16 %v541_v54, %v539_v53  ;;  %v544_v56 = vld [vmem:[#allocation3 + $0xc8] sm:$0xff]  ;;  %v546_v57 = vld [vmem:[#allocation3 + $0xd8] sm:$0xff]  ;;  %v543_v59 = vld [vmem:[#allocation3 + $0xc0] sm:$0xff]  ;;  %p1600_p13 = pneg %p1599_p11  ;;  %p1605_p3 = scmp.lt.s32.totalorder %s1603_s8, %s1597_s29 }
  0x45   : > { %1396 = vmatprep.mubr.msk.f32.mxu0 %vm207_vm0, %v205_v13  ;;  %1426 = vmatpush1.bf16.msra.mxu0 %v1425_v12  ;;  %v1451_v58 = vpack.c.bf16 %v546_v57, %v544_v56  ;;  %v545_v60 = vld [vmem:[#allocation3 + $0xd0] sm:$0xff]  ;;  %v548_v62 = vld [vmem:[#allocation3 + $0xe8] sm:$0xff]  ;;  %v550_v63 = vld [vmem:[#allocation3 + $0xf8] sm:$0xff] }
  0x46   : > { %1428 = vmatprep.subr.bf16.mxu0 %v1427_v14  ;;  %1444 = vmatprep.subr.bf16.mxu1 %v1443_v46  ;;  %v1453_v61 = vpack.c.bf16 %v545_v60, %v543_v59  ;;  %v1455_v0 = vpack.c.bf16 %v550_v63, %v548_v62  ;;  %v547_v1 = vld [vmem:[#allocation3 + $0xe0] sm:$0xff]  ;;  %v549_v2 = vld [vmem:[#allocation3 + $0xf0] sm:$0xff]  ;;  %v781_v4 = vld [vmem:[#allocation3 + $0x108] sm:$0xff]  ;;  %p1606_p5 = por %p1605_p3, %p1604_p1 }
  0x47   : > { %1446 = vmatpush1.bf16.msra.mxu1 %v1445_v49  ;;  %v783_v5 = vld [vmem:[#allocation3 + $0x118] sm:$0xff]  ;;  %v780_v14 = vld [vmem:[#allocation3 + $0x100] sm:$0xff]  ;;  %v782_v15 = vld [vmem:[#allocation3 + $0x110] sm:$0xff] }
  0x48   : > { %1397 = vmatmul.mubr.msk.f32.gmra.mrb[2].mxu0 %vm207_vm0, %v206_v19  ;;  %1448 = vmatprep.subr.bf16.mxu1 %v1447_v52  ;;  %v1463_v6 = vpack.c.bf16 %v783_v5, %v781_v4  ;;  %v785_v17 = vld [vmem:[#allocation3 + $0x128] sm:$0xff]  ;;  %v787_v18 = vld [vmem:[#allocation3 + $0x138] sm:$0xff]  ;;  %v1465_v19 = vpack.c.bf16 %v782_v15, %v780_v14  ;;  %v784_v22 = vld [vmem:[#allocation3 + $0x120] sm:$0xff]  ;;  %p1607_p6 = pnand %p1606_p5, %p1600_p13 }
  0x49   : > { %1430 = vmatpush1.bf16.msra.mxu0 %v1429_v20  ;;  %398 = vmatprep.mubr.f32.mxu0 %v1684_v31  ;;  %v786_v23 = vld [vmem:[#allocation3 + $0x130] sm:$0xff]  ;;  %v789_v25 = vld [vmem:[#allocation3 + $0x148] sm:$0xff] }
  0x4a   : > { %1432 = vmatprep.subr.bf16.mxu0 %v1431_v21  ;;  %v1467_v21 = vpack.c.bf16 %v787_v18, %v785_v17 }
  0x4b   : > { %1450 = vmatpush1.bf16.msra.mxu1 %v1449_v55 }
  0x4c   : > { %1452 = vmatprep.subr.bf16.mxu1 %v1451_v58 }
  0x4d   : > { %1434 = vmatpush1.bf16.msra.mxu0 %v1433_v26  ;;  %v791_v26 = vld [vmem:[#allocation3 + $0x158] sm:$0xff] }
  0x4e   : > { %1436 = vmatprep.subr.bf16.mxu0 %v1435_v27  ;;  %v1469_v27 = vpack.c.bf16 %v786_v23, %v784_v22  ;;  %v1471_v29 = vpack.c.bf16 %v791_v26, %v789_v25 }
  0x4f   : > { %1454 = vmatpush1.bf16.msra.mxu1 %v1453_v61 }
  0x50   : > { %1456 = vmatprep.subr.bf16.mxu1 %v1455_v0 }
  0x51   : > { %1438 = vmatpush1.bf16.msra.mxu0 %v1437_v30  ;;  %v788_v30 = vld [vmem:[#allocation3 + $0x140] sm:$0xff] }
  0x52   : > { %1440 = vmatprep.subr.bf16.mxu0 %v1812_v3 }
 0x117   : > { %v1395_v32 = vpop.f32.mrb[0].mxu0 }
 0x118   : > { %v286_v33 = vpop.f32.mrb[1].mxu0 }
 0x119   : > { %1308 = vmatmul.mubr.msk.f32.vlgmr.msra.gmra.mrb[4].mxu0 %vm321_vm1, %v286_v33 }
 0x11a   : > { %1442 = vmatpush3.bf16.msra.mxu0 %v1812_v3  ;;  %404 = vmatprep.mubr.f32.mxu0 %v1684_v31 }
 0x11b   : > { %v1398_v34 = vpop.f32.mrb[2].mxu0  ;;  %1460 = vmatprep.subr.bf16.mxu0 %v1812_v3 }
 0x11c   : > { %v296_v35 = vpop.f32.mrb[3].mxu0 }
 0x11d   : > { %1309 = vmatmul.mubr.msk.f32.gmra.mrb[6].mxu0 %vm321_vm1, %v1395_v32  ;;  %v790_v32 = vld [vmem:[#allocation3 + $0x150] sm:$0xff] }
 0x11e   : > { %410 = vmatprep.mubr.f32.mxu0 %v1684_v31 }
 0x121   : > { %1310 = vmatmul.mubr.msk.f32.gmra.mrb[8].mxu0 %vm321_vm1, %v296_v35  ;;  %v795_v35 = vld [vmem:[#allocation3 + $0x178] sm:$0xff] }
 0x122   : > { %416 = vmatprep.mubr.f32.mxu0 %v1684_v31 }
 0x125   : > { %1311 = vmatmul.mubr.msk.f32.gmra.mrb[10].mxu0 %vm321_vm1, %v1398_v34  ;;  %v793_v34 = vld [vmem:[#allocation3 + $0x168] sm:$0xff] }
 0x126   : > { %1403 = vmatprep.mubr.msk.f32.mxu0 %vm207_vm0, %v1312_v36  ;;  %v1473_v36 = vpack.c.bf16 %v790_v32, %v788_v30 }
 0x129   : > { %1404 = vmatmul.mubr.msk.f32.vlgmr.msra.gmra.mrb[12].mxu0 %vm207_vm0, %v1313_v37  ;;  %v1475_v37 = vpack.c.bf16 %v795_v35, %v793_v34 }
 0x12a   : > { %1406 = vmatprep.mubr.msk.f32.mxu0 %vm207_vm0, %v1314_v38  ;;  %1462 = vmatpush3.bf16.msra.mxu0 %v1812_v3  ;;  %v1457_v3 = vpack.c.bf16 %v549_v2, %v547_v1  ;;  %v792_v38 = vld [vmem:[#allocation3 + $0x160] sm:$0xff] }
 0x12c   : > { %1458 = vmatpush1.bf16.msra.mxu1 %v1457_v3 }
 0x12d   : > { %1407 = vmatmul.mubr.msk.f32.gmra.mrb[14].mxu0 %vm207_vm0, %v1315_v39  ;;  %1464 = vmatprep.subr.bf16.mxu1 %v1463_v6  ;;  %v794_v39 = vld [vmem:[#allocation3 + $0x170] sm:$0xff] }
 0x12e   : > { %1413 = vmatprep.mubr.msk.f32.mxu0 %vm207_vm0, %v1324_v40 }
 0x131   : > { %1414 = vmatmul.mubr.msk.f32.vlgmr.msra.gmra.mrb[16].mxu0 %vm207_vm0, %v1325_v41 }
 0x132   : > { %1416 = vmatprep.mubr.msk.f32.mxu0 %vm207_vm0, %v1326_v42  ;;  %v1477_v42 = vpack.c.bf16 %v794_v39, %v792_v38 }
 0x135   : > { %1417 = vmatmul.mubr.msk.f32.gmra.mrb[18].mxu0 %vm207_vm0, %v1327_v43 }
 0x1ec   : > { %v400_v7 = vpop.f32.mrb[4].mxu0 }
 0x1ed   : > { %v1874_v8 = vpop.f32.mrb[5].mxu0 }
 0x1f0   : > { %v1876_v9 = vpop.f32.mrb[6].mxu0 }
 0x1f1   : > { %v1878_v10 = vpop.f32.mrb[7].mxu0 }
 0x1f4   : > { %v1880_v11 = vpop.f32.mrb[8].mxu0 }
 0x1f5   : > { %v1882_v12 = vpop.f32.mrb[9].mxu0 }
 0x1f8   : > { %v1884_v13 = vpop.f32.mrb[10].mxu0 }
 0x1f9   : > { %v1886_v16 = vpop.f32.mrb[11].mxu0 }
 0x1fc   : > { %v1405_v20 = vpop.f32.mrb[12].mxu0 }
 0x1fd   : > { %v515_v24 = vpop.f32.mrb[13].mxu0 }
 0x1fe   : > { %1320 = vmatmul.mubr.msk.f32.vlgmr.msra.gmra.mrb[0].mxu1 %vm321_vm1, %v515_v24 }
 0x1ff   : > { %1466 = vmatpush1.bf16.msra.mxu1 %v1465_v19  ;;  %633 = vmatprep.mubr.f32.mxu1 %v1684_v31 }
 0x200   : > { %1468 = vmatprep.subr.bf16.mxu1 %v1467_v21  ;;  %v1408_v28 = vpop.f32.mrb[14].mxu0 }
 0x201   : > { %v525_v33 = vpop.f32.mrb[15].mxu0 }
 0x202   : > { %1321 = vmatmul.mubr.msk.f32.gmra.mrb[2].mxu1 %vm321_vm1, %v1405_v20 }
 0x203   : > { %1470 = vmatpush1.bf16.msra.mxu1 %v1469_v27  ;;  %639 = vmatprep.mubr.f32.mxu1 %v1684_v31 }
 0x204   : > { %1472 = vmatprep.subr.bf16.mxu1 %v1471_v29  ;;  %v1415_v40 = vpop.f32.mrb[16].mxu0 }
 0x205   : > { %v760_v41 = vpop.f32.mrb[17].mxu0 }
 0x206   : > { %1322 = vmatmul.mubr.msk.f32.gmra.mrb[4].mxu1 %vm321_vm1, %v525_v33 }
 0x207   : > { %1474 = vmatpush1.bf16.msra.mxu1 %v1473_v36  ;;  %645 = vmatprep.mubr.f32.mxu1 %v1684_v31 }
 0x208   : > { %1476 = vmatprep.subr.bf16.mxu1 %v1475_v37  ;;  %v1418_v43 = vpop.f32.mrb[18].mxu0 }
 0x209   : > { %v770_v44 = vpop.f32.mrb[19].mxu0 }
 0x20a   : > { %1323 = vmatmul.mubr.msk.f32.gmra.mrb[6].mxu1 %vm321_vm1, %v1408_v28 }
 0x20b   : > { %1478 = vmatpush1.bf16.msra.mxu1 %v1477_v42  ;;  %872 = vmatprep.mubr.f32.mxu1 %v1684_v31 }
 0x20e   : > { %1332 = vmatmul.mubr.msk.f32.vlgmr.msra.gmra.mrb[0].mxu1 %vm321_vm1, %v760_v41 }
 0x20f   : > { %878 = vmatprep.mubr.f32.mxu1 %v1684_v31 }
 0x212   : > { %1333 = vmatmul.mubr.msk.f32.gmra.mrb[2].mxu1 %vm321_vm1, %v1415_v40 }
 0x213   : > { %884 = vmatprep.mubr.f32.mxu1 %v1684_v31 }
 0x216   : > { %1334 = vmatmul.mubr.msk.f32.gmra.mrb[4].mxu1 %vm321_vm1, %v770_v44 }
 0x217   : > { %890 = vmatprep.mubr.f32.mxu1 %v1684_v31 }
 0x21a   : > { %1335 = vmatmul.mubr.msk.f32.gmra.mrb[6].mxu1 %vm321_vm1, %v1418_v43 }
 0x2e1   : > { %v874_v45 = vpop.f32.mrb[0].mxu1 }
 0x2e2   : > { %v1479_v46 = vadd.f32 %v874_v45, %v400_v7  ;;  %v876_v47 = vpop.f32.mrb[1].mxu1 }
 0x2e3   : > { %v1480_v48 = vadd.f32 %v876_v47, %v1874_v8 }
 0x2e4   : > { %vm925_vm2 = vcmp.gt.f32.partialorder %v1479_v46, 0.0  ;;  %v929_v49 = vmul.f32 0.1, %v1479_v46 }
 0x2e5   : > { %vm1057_vm4 = vcmp.gt.f32.partialorder %v1480_v48, 0.0  ;;  %v1061_v50 = vmul.f32 0.1, %v1480_v48  ;;  %v880_v51 = vpop.f32.mrb[2].mxu1 }
 0x2e6   : > { %v1481_v52 = vadd.f32 %v880_v51, %v1876_v9  ;;  %v882_v53 = vpop.f32.mrb[3].mxu1  ;;  %v933_v31 = vsel %vm925_vm2, %v1479_v46, %v929_v49 }
 0x2e7   : > { %v1482_v54 = vadd.f32 %v882_v53, %v1878_v10  ;;  %962 = vrot.lane.b32.xlu0 %v933_v31, %s1685_s19  ;;  %938 = vst.msk [vmem:[%s1910_s21] sm:$0xff] %vm937_vm3, %v933_v31  ;;  %v1065_v55 = vsel %vm1057_vm4, %v1480_v48, %v1061_v50 }
 0x2e8   : > { %vm926_vm5 = vcmp.gt.f32.partialorder %v1481_v52, 0.0  ;;  %v930_v56 = vmul.f32 0.1, %v1481_v52  ;;  %1348 = vst.msk [vmem:[%s1910_s21 + $0x80] sm:$0xff] %vm937_vm3, %v1065_v55 }
 0x2e9   : > { %vm1058_vm6 = vcmp.gt.f32.partialorder %v1482_v54, 0.0  ;;  %v1062_v57 = vmul.f32 0.1, %v1482_v54  ;;  %v886_v58 = vpop.f32.mrb[4].mxu1 }
 0x2ea   : > { %v1483_v59 = vadd.f32 %v886_v58, %v1880_v11  ;;  %v888_v60 = vpop.f32.mrb[5].mxu1  ;;  %v934_v61 = vsel %vm926_vm5, %v1481_v52, %v930_v56 }
 0x2eb   : > { %v1484_v62 = vadd.f32 %v888_v60, %v1882_v12  ;;  %999 = vrot.lane.b32.xlu0 %v933_v31, %s1686_s23  ;;  %1001 = vrot.lane.b32.xlu1 %v934_v61, %s1686_s23  ;;  %939 = vst.msk [vmem:[%s1910_s21 + $0x8] sm:$0xff] %vm937_vm3, %v934_v61  ;;  %v1066_v63 = vsel %vm1058_vm6, %v1482_v54, %v1062_v57 }
 0x2ec   : > { %vm927_vm7 = vcmp.gt.f32.partialorder %v1483_v59, 0.0  ;;  %v931_v0 = vmul.f32 0.1, %v1483_v59  ;;  %1349 = vst.msk [vmem:[%s1910_s21 + $0x88] sm:$0xff] %vm937_vm3, %v1066_v63 }
 0x2ed   : > { %vm1059_vm8 = vcmp.gt.f32.partialorder %v1484_v62, 0.0  ;;  %v1063_v1 = vmul.f32 0.1, %v1484_v62  ;;  %v892_v2 = vpop.f32.mrb[6].mxu1 }
 0x2ee   : > { %v1485_v3 = vadd.f32 %v892_v2, %v1884_v13  ;;  %v894_v4 = vpop.f32.mrb[7].mxu1  ;;  %v935_v5 = vsel %vm927_vm7, %v1483_v59, %v931_v0 }
 0x2ef   : > { %v1486_v6 = vadd.f32 %v894_v4, %v1886_v16  ;;  %1036 = vrot.lane.b32.xlu0 %v933_v31, %s1687_s28  ;;  %1038 = vrot.lane.b32.xlu1 %v934_v61, %s1687_s28  ;;  %940 = vst.msk [vmem:[%s1910_s21 + $0x10] sm:$0xff] %vm937_vm3, %v935_v5  ;;  %v1067_v7 = vsel %vm1059_vm8, %v1484_v62, %v1063_v1 }
 0x2f0   : > { %vm928_vm9 = vcmp.gt.f32.partialorder %v1485_v3, 0.0  ;;  %v932_v8 = vmul.f32 0.1, %v1485_v3  ;;  %1350 = vst.msk [vmem:[%s1910_s21 + $0x90] sm:$0xff] %vm937_vm3, %v1067_v7 }
 0x2f1   : > { %vm1060_vm10 = vcmp.gt.f32.partialorder %v1486_v6, 0.0  ;;  %v1064_v9 = vmul.f32 0.1, %v1486_v6 }
 0x2f2   : > { %v936_v10 = vsel %vm928_vm9, %v1485_v3, %v932_v8 }
 0x2f3   : > { %1094 = vrot.lane.b32.xlu0 %v1065_v55, %s1685_s19  ;;  %1096 = vrot.lane.b32.xlu1 %v1066_v63, %s1685_s19  ;;  %941 = vst.msk [vmem:[%s1910_s21 + $0x18] sm:$0xff] %vm937_vm3, %v936_v10  ;;  %v1068_v11 = vsel %vm1060_vm10, %v1486_v6, %v1064_v9 }
 0x2f4   : > { %1351 = vst.msk [vmem:[%s1910_s21 + $0x98] sm:$0xff] %vm937_vm3, %v1068_v11 }
 0x2f7   : > { %1131 = vrot.lane.b32.xlu0 %v1065_v55, %s1686_s23  ;;  %1133 = vrot.lane.b32.xlu1 %v1066_v63, %s1686_s23 }
 0x2fb   : > { %1168 = vrot.lane.b32.xlu0 %v1065_v55, %s1687_s28  ;;  %1170 = vrot.lane.b32.xlu1 %v1066_v63, %s1687_s28 }
 0x2ff   : > { %964 = vrot.lane.b32.xlu0 %v934_v61, %s1685_s19  ;;  %966 = vrot.lane.b32.xlu1 %v935_v5, %s1685_s19 }
 0x303   : > { %1003 = vrot.lane.b32.xlu0 %v935_v5, %s1686_s23  ;;  %968 = vrot.lane.b32.xlu1 %v936_v10, %s1685_s19 }
 0x307   : > { %1040 = vrot.lane.b32.xlu0 %v935_v5, %s1687_s28  ;;  %1005 = vrot.lane.b32.xlu1 %v936_v10, %s1686_s23 }
 0x30b   : > { %1098 = vrot.lane.b32.xlu0 %v1067_v7, %s1685_s19  ;;  %1042 = vrot.lane.b32.xlu1 %v936_v10, %s1687_s28 }
 0x30f   : > { %1135 = vrot.lane.b32.xlu0 %v1067_v7, %s1686_s23  ;;  %1100 = vrot.lane.b32.xlu1 %v1068_v11, %s1685_s19 }
 0x313   : > { %1172 = vrot.lane.b32.xlu0 %v1067_v7, %s1687_s28  ;;  %1137 = vrot.lane.b32.xlu1 %v1068_v11, %s1686_s23 }
 0x317   : > { %1174 = vrot.lane.b32.xlu1 %v1068_v11, %s1687_s28 }
 0x359   : > { %v963_v12 = vpop.permute.xlu0 %962 }
 0x35a   : > { %1336 = vst.msk [vmem:[%s1910_s21 + $0x20] sm:$0xff] %vm937_vm3, %v963_v12 }
 0x35d   : > { %v1000_v13 = vpop.permute.xlu0 %999  ;;  %v1002_v14 = vpop.permute.xlu1 %1001 }
 0x35e   : > { %1340 = vst.msk [vmem:[%s1910_s21 + $0x40] sm:$0xff] %vm937_vm3, %v1000_v13  ;;  %1341 = vst.msk [vmem:[%s1910_s21 + $0x48] sm:$0xff] %vm937_vm3, %v1002_v14 }
 0x361   : > { %v1037_v15 = vpop.permute.xlu0 %1036  ;;  %v1039_v16 = vpop.permute.xlu1 %1038 }
 0x362   : > { %1344 = vst.msk [vmem:[%s1910_s21 + $0x60] sm:$0xff] %vm937_vm3, %v1037_v15  ;;  %1345 = vst.msk [vmem:[%s1910_s21 + $0x68] sm:$0xff] %vm937_vm3, %v1039_v16 }
 0x365   : > { %v1095_v17 = vpop.permute.xlu0 %1094  ;;  %v1097_v18 = vpop.permute.xlu1 %1096 }
 0x366   : > { %1352 = vst.msk [vmem:[%s1910_s21 + $0xa0] sm:$0xff] %vm937_vm3, %v1095_v17  ;;  %1353 = vst.msk [vmem:[%s1910_s21 + $0xa8] sm:$0xff] %vm937_vm3, %v1097_v18 }
 0x369   : > { %v1132_v19 = vpop.permute.xlu0 %1131  ;;  %v1134_v20 = vpop.permute.xlu1 %1133 }
 0x36a   : > { %1356 = vst.msk [vmem:[%s1910_s21 + $0xc0] sm:$0xff] %vm937_vm3, %v1132_v19  ;;  %1357 = vst.msk [vmem:[%s1910_s21 + $0xc8] sm:$0xff] %vm937_vm3, %v1134_v20 }
 0x36d   : > { %v1169_v21 = vpop.permute.xlu0 %1168  ;;  %v1171_v22 = vpop.permute.xlu1 %1170 }
 0x36e   : > { %1360 = vst.msk [vmem:[%s1910_s21 + $0xe0] sm:$0xff] %vm937_vm3, %v1169_v21  ;;  %1361 = vst.msk [vmem:[%s1910_s21 + $0xe8] sm:$0xff] %vm937_vm3, %v1171_v22 }
 0x371   : > { %v965_v23 = vpop.permute.xlu0 %964  ;;  %v967_v24 = vpop.permute.xlu1 %966 }
 0x372   : > { %1337 = vst.msk [vmem:[%s1910_s21 + $0x28] sm:$0xff] %vm937_vm3, %v965_v23  ;;  %1338 = vst.msk [vmem:[%s1910_s21 + $0x30] sm:$0xff] %vm937_vm3, %v967_v24 }
 0x375   : > { %v1004_v25 = vpop.permute.xlu0 %1003  ;;  %v969_v26 = vpop.permute.xlu1 %968 }
 0x376   : > { %1342 = vst.msk [vmem:[%s1910_s21 + $0x50] sm:$0xff] %vm937_vm3, %v1004_v25  ;;  %1339 = vst.msk [vmem:[%s1910_s21 + $0x38] sm:$0xff] %vm937_vm3, %v969_v26 }
 0x379   : > { %v1041_v27 = vpop.permute.xlu0 %1040  ;;  %v1006_v28 = vpop.permute.xlu1 %1005 }
 0x37a   : > { %1346 = vst.msk [vmem:[%s1910_s21 + $0x70] sm:$0xff] %vm937_vm3, %v1041_v27  ;;  %1343 = vst.msk [vmem:[%s1910_s21 + $0x58] sm:$0xff] %vm937_vm3, %v1006_v28 }
 0x37d   : > { %v1099_v29 = vpop.permute.xlu0 %1098  ;;  %v1043_v30 = vpop.permute.xlu1 %1042 }
 0x37e   : > { %1354 = vst.msk [vmem:[%s1910_s21 + $0xb0] sm:$0xff] %vm937_vm3, %v1099_v29  ;;  %1347 = vst.msk [vmem:[%s1910_s21 + $0x78] sm:$0xff] %vm937_vm3, %v1043_v30 }
 0x381   : > { %v1136_v32 = vpop.permute.xlu0 %1135  ;;  %v1101_v33 = vpop.permute.xlu1 %1100 }
 0x382   : > { %1358 = vst.msk [vmem:[%s1910_s21 + $0xd0] sm:$0xff] %vm937_vm3, %v1136_v32  ;;  %1355 = vst.msk [vmem:[%s1910_s21 + $0xb8] sm:$0xff] %vm937_vm3, %v1101_v33 }
 0x385   : > { %v1173_v34 = vpop.permute.xlu0 %1172  ;;  %v1138_v35 = vpop.permute.xlu1 %1137 }
 0x386   : > { %1362 = vst.msk [vmem:[%s1910_s21 + $0xf0] sm:$0xff] %vm937_vm3, %v1173_v34  ;;  %1359 = vst.msk [vmem:[%s1910_s21 + $0xd8] sm:$0xff] %vm937_vm3, %v1138_v35 }
 0x389   : > { %v1175_v36 = vpop.permute.xlu1 %1174 }
 0x38a   : > { %1363 = vst.msk [vmem:[%s1910_s21 + $0xf8] sm:$0xff] %vm937_vm3, %v1175_v36 }
 0x38b   : > { %1610 = shalt.err (!%p1607_p6)
}
 0x38c   : > { %s1611_s9 = scalar_lea.hbm %s2006_s26, 4096  ;;  %s1615_s18 = scalar_lea.hbm %s2063_s3, 8192 }
 0x38d   : > { %p1612_p7 = scmp.ne.s32.totalorder %s2006_s26, %s1611_s9  ;;  %p1616_p0 = scmp.lt.u32.totalorder %s2006_s26, %s2063_s3 }
 0x38e   : > { %p1617_p2 = scmp.lt.u32.totalorder %s1615_s18, %s1611_s9  ;;  %p1619_p8 = scmp.lt.u32.totalorder %s1611_s9, %s2006_s26 }
 0x38f   : > { %p1613_p9 = pnand %p1612_p7, %p2075_p10 }
 0x390   : > { %p1618_p4 = por %p1617_p2, %p1616_p0 }
 0x391   : > { %p1614_p12 = pneg %p1613_p9 }
 0x392   : > { %p1620_p11 = por %p1619_p8, %p1618_p4 }
 0x394   : > { %p1621_p13 = pnand %p1620_p11, %p1614_p12 }
 0x396   : > { %1624 = shalt.err (!%p1621_p13)
}
 0x397   : > { %s1689_s23 = smov 128   ;;  %s1690_s28 = smov 8  }
 0x398   : > { %1499 = dma.vmem_to_hbm [thread:$0]  (%p2075_p10), %s2008_s5, 4096, %s2006_s26, %s2014_s15, %s1689_s23, %s1689_s23, %s1690_s28  }
 0x399 PF: > { %p1511_p1 = scmp.ge.s32.totalorder %s1679_s17, 2  ;;  %s1216_s4 = sand.u32 1, %s1659_s12  }
 0x39a   : > { %p2076_p3 = scmp.ne.s32.totalorder %s2069_s24, 0  ;;  %s1217_s30 = scalar_lea.sflag [#allocation5], %s1216_s4 }
 0x39c   : > { %p1506_p5 = pnand %p1511_p1, %p2076_p3 }
 0x39e   : > { %1654 = dma.done.wait (!%p1506_p5), %s1217_s30, 4096  }
 0x39f   : > { %1656 = vsyncadd (!%p1506_p5), %s1217_s30, 4294963200  ;;  %s17_s17 = sadd.s32 1, %s1679_s17   ;;  %s2077_s12 = smov %s1663_s13 }
 0x3a0   : > { %p14_p6 = scmp.ge.s32.totalorder %s17_s17, 4   ;;  %s2078_s13 = smov %s1667_s14 }
 0x3a1   : > { %s2079_s14 = smov %s1764_s25  ;;  %s2080_s15 = smov %s1675_s16 }
 0x3a2   : > { %s2081_s16 = smov %s2083_s20  ;;  %16 = sbr.rel (!%p14_p6) target bundleno = 5 (0x5), region = 84 }
 0x3a9   :  { %1222 = vsyncpa [#allocation4], 1 }
 0x3aa   :  { %1224 = vsyncpa [#allocation4 + $0x1], 1 }
 0x3ab   :  { %1225 = vsyncpa [#allocation5], 1 }
 0x3ac   :  { %1227 = vsyncpa [#allocation5 + $0x1], 1 }

</bundles_post_ra>
